<compile_context>
chip_gen: v5e
topology: v5e:2x2
jax: 0.10.0
libtpu: 0.0.40
codegen_flags: <defaults>
</compile_context>

<pallas_src>
import jax
import jax.numpy as jnp
from jax.experimental import pallas as pl
from jax.experimental.pallas import tpu as pltpu


def _round_up(n, m):
    return ((n + m - 1) // m) * m


def _affine_kernel(x_ref, a_ref, c_ref, out_ref):
    # One (tb, K) x (K, out_lanes) MXU matmul + broadcast bias add per batch tile.
    out_ref[...] = (
        jnp.dot(x_ref[...], a_ref[...], preferred_element_type=jnp.float32)
        + c_ref[...]
    ).astype(out_ref.dtype)


def fold_affine(params):
    """Collapse the (purely affine) module into out = x @ A + c (exact algebra;
    only f32 reassociation differs from the step-by-step forward)."""
    d = params["wh"].shape[0]
    w1 = params["w1"]                                         # (6D, 3D)
    blocks = [w1[j * d:(j + 1) * d, :] for j in range(6)]     # static row blocks
    sum_scaled = sum((j + 1) * blocks[j] for j in range(5))   # sum_i i * w1_{i-1}
    sum_plain = sum(blocks[j] for j in range(5))              # sum_i w1_{i-1}
    m = params["wh"] @ sum_scaled + blocks[5]                 # (D, 3D)
    cz = params["bh"] @ sum_plain + params["b1"]              # (1, 3D)
    a = m @ params["w2"]                                      # (D, out_dim)
    c = cz @ params["w2"] + params["b2"]                      # (1, out_dim)
    return a.astype(jnp.float32), c.astype(jnp.float32)


def _plan_tile_rows(n_rows, in_row_bytes, out_row_bytes, resident_bytes,
                    block_bytes, vmem_budget=40 * 1024 * 1024):
    """Pick a sublane-aligned batch tile sized by bytes (not rows)."""
    tb = max(8, (block_bytes // max(in_row_bytes, 1)) // 8 * 8)
    tb = min(tb, _round_up(n_rows, 8))
    # Keep the double-buffered x/out pipeline (+ resident A, c) inside budget.
    while tb > 8 and 2 * tb * (in_row_bytes + out_row_bytes) + resident_bytes > vmem_budget:
        tb = max(8, ((tb // 2) // 8) * 8)
    return tb


def potential_energy_cell(x, params, *, block_bytes=4 * 1024 * 1024, use_pallas=None):
    """x: (B, D) float32/bf16; params: dict(wh, bh, w1, b1, w2, b2) as in the module."""
    b, d = x.shape
    a, c = fold_affine(params)                # (D, out_dim), (1, out_dim), f32
    out_dim = a.shape[1]

    if use_pallas is None:
        use_pallas = b >= 4096                # tiny batches: launch overhead dominates
    if not use_pallas:
        return (jnp.dot(x, a, preferred_element_type=jnp.float32) + c).astype(x.dtype)

    # ---- lane packing / lane-dense output prep (batch independent, tiny) ----
    pack = 128 // d if (d < 128 and 128 % d == 0) else 1
    if pack > 1 and b % pack == 0:
        # Pack `pack` rows of x into one 128-lane row; block-diagonal A.
        outp = _round_up(out_dim, d)                          # per-sub-block out width
        a_pad = jnp.pad(a, ((0, 0), (0, outp - out_dim)))
        c_pad = jnp.pad(c, ((0, 0), (0, outp - out_dim)))
        a_k = jnp.kron(jnp.eye(pack, dtype=a.dtype), a_pad)   # (pack*D, pack*outp)
        c_k = jnp.tile(c_pad, (1, pack))                      # (1, pack*outp)
        x_k = x.reshape(b // pack, pack * d)                  # free, contiguous
    else:
        pack = 1
        outp = _round_up(out_dim, 128) if out_dim < 128 else out_dim
        a_k = jnp.pad(a, ((0, 0), (0, outp - out_dim)))
        c_k = jnp.pad(c, ((0, 0), (0, outp - out_dim)))
        x_k = x

    n_rows, k_dim = x_k.shape
    out_lanes = a_k.shape[1]
    itemsize = jnp.dtype(x.dtype).itemsize
    resident_bytes = a_k.size * 4 + c_k.size * 4

    tb = _plan_tile_rows(n_rows, k_dim * itemsize, out_lanes * itemsize,
                         resident_bytes, block_bytes)
    grid = pl.cdiv(n_rows, tb)                # ragged tail handled by Pallas, no jnp.pad

    cost = pl.CostEstimate(
        flops=int(2 * n_rows * k_dim * out_lanes),
        transcendentals=0,
        bytes_accessed=int(n_rows * (k_dim + out_lanes) * itemsize + resident_bytes),
    )

    out_k = pl.pallas_call(
        _affine_kernel,
        out_shape=jax.ShapeDtypeStruct((n_rows, out_lanes), x.dtype),
        grid_spec=pltpu.PrefetchScalarGridSpec(
            num_scalar_prefetch=0,
            grid=(grid,),
            in_specs=[
                pl.BlockSpec((tb, k_dim), lambda i: (i, 0)),        # x: tiled on batch
                pl.BlockSpec((k_dim, out_lanes), lambda i: (0, 0)),  # A: resident
                pl.BlockSpec((1, out_lanes), lambda i: (0, 0)),      # c: resident
            ],
            out_specs=pl.BlockSpec((tb, out_lanes), lambda i: (i, 0)),
        ),
        compiler_params=pltpu.CompilerParams(
            dimension_semantics=("parallel",),          # megacore on v7x; no-op v5e/v6e
            vmem_limit_bytes=48 * 1024 * 1024,
        ),
        cost_estimate=cost,
    )(x_k, a_k, c_k)

    if pack > 1:
        out = out_k.reshape(n_rows, pack, outp)[:, :, :out_dim].reshape(b, out_dim)
    else:
        out = out_k[:, :out_dim]
    return out


def make_params(key, input_dim, output_dim):
    """Deterministic synthetic parameters (shapes follow the module's __init__).
    Weights are stored pre-transposed relative to torch (y = x @ W + b)."""
    ks = jax.random.split(key, 6)
    scale = 0.1
    wh = scale * jax.random.normal(ks[0], (input_dim, input_dim), jnp.float32)
    bh = scale * jax.random.normal(ks[1], (1, input_dim), jnp.float32)
    w1 = scale * jax.random.normal(ks[2], (input_dim * 6, input_dim * 3), jnp.float32)
    b1 = scale * jax.random.normal(ks[3], (1, input_dim * 3), jnp.float32)
    w2 = scale * jax.random.normal(ks[4], (input_dim * 3, output_dim), jnp.float32)
    b2 = scale * jax.random.normal(ks[5], (1, output_dim), jnp.float32)
    return dict(wh=wh, bh=bh, w1=w1, b1=b1, w2=w2, b2=b2)


def reference(x, p):
    """Pure-JAX transcription of the original torch forward (no folding)."""
    feats = []
    for s in (1.0, 2.0, 3.0, 4.0, 5.0):
        feats.append((s * x) @ p["wh"] + p["bh"])
    feats.append(x)
    y = jnp.concatenate(feats, axis=-1)
    z = y @ p["w1"] + p["b1"]
    return z @ p["w2"] + p["b2"]


if __name__ == "__main__":
    input_dim, output_dim = 16, 1
    key = jax.random.PRNGKey(0)
    kp, k1, k2, k3 = jax.random.split(key, 4)
    params = make_params(kp, input_dim, output_dim)

    # Case 1: lane-packed path (B % 8 == 0, D=16 -> x packed to 128 lanes), one tile.
    x1 = jax.random.normal(k1, (64, input_dim), jnp.float32)
    o1 = jax.block_until_ready(potential_energy_cell(x1, params, use_pallas=True))
    assert o1.shape == (64, output_dim)
    assert jnp.allclose(o1, reference(x1, params), atol=5e-4, rtol=5e-4), "case1 mismatch"

    # Case 2: ragged batch (B % 8 != 0) -> unpacked path, no wrapper pad; Pallas pads
    # the partial block; output lanes padded to 128 and sliced back.
    x2 = jax.random.normal(k2, (13, input_dim), jnp.float32)
    o2 = jax.block_until_ready(potential_energy_cell(x2, params, use_pallas=True))
    assert o2.shape == (13, output_dim)
    assert jnp.allclose(o2, reference(x2, params), atol=5e-4, rtol=5e-4), "case2 mismatch"

    # Case 3: tiny block_bytes forces a multi-step grid so the resident A/c specs and
    # the double-buffered x/out pipeline are exercised.
    x3 = jax.random.normal(k3, (256, input_dim), jnp.float32)
    o3 = jax.block_until_ready(
        potential_energy_cell(x3, params, block_bytes=4096, use_pallas=True))
    assert o3.shape == (256, output_dim)
    assert jnp.allclose(o3, reference(x3, params), atol=5e-4, rtol=5e-4), "case3 mismatch"

    print("KERNEL_OK")
</pallas_src>

<mosaic_0001>
module attributes {stable_mosaic.version = 11 : i64} {
  func.func @_affine_kernel(%arg0: i32, %arg1: memref<8x128xf32, #tpu.memory_space<vmem>>, %arg2: memref<128x128xf32, #tpu.memory_space<vmem>>, %arg3: memref<1x128xf32, #tpu.memory_space<vmem>>, %arg4: memref<8x128xf32, #tpu.memory_space<vmem>>) attributes {dimension_semantics = [#tpu.dimension_semantics<parallel>], iteration_bounds = array<i64: 1>, scalar_prefetch = 0 : i64, scratch_operands = 0 : i64, tpu.core_type = #tpu.core_type<tc>, window_params = [{transform_indices = @transform_0, window_bounds = array<i64: 8, 128>}, {pipeline_mode = #tpu.pipeline_mode<synchronous>, transform_indices = @transform_1, window_bounds = array<i64: 128, 128>}, {pipeline_mode = #tpu.pipeline_mode<synchronous>, transform_indices = @transform_2, window_bounds = array<i64: 1, 128>}, {transform_indices = @transform_3, window_bounds = array<i64: 8, 128>}]} {
    %c0 = arith.constant 0 : index
    %c0_0 = arith.constant 0 : index
    %0 = vector.load %arg1[%c0, %c0_0] : memref<8x128xf32, #tpu.memory_space<vmem>>, vector<8x128xf32>
    %c0_1 = arith.constant 0 : index
    %c0_2 = arith.constant 0 : index
    %1 = vector.load %arg2[%c0_1, %c0_2] : memref<128x128xf32, #tpu.memory_space<vmem>>, vector<128x128xf32>
    %cst = arith.constant dense<0.000000e+00> : vector<8x128xf32>
    %2 = tpu.matmul %0, %1, %cst {dimension_numbers = #tpu.dot_dimension_numbers<[1], [0], [0], [1], [0, 0, 1, 1], [], []>} : vector<8x128xf32>, vector<128x128xf32>, vector<8x128xf32> -> vector<8x128xf32>
    %c0_3 = arith.constant 0 : index
    %c0_4 = arith.constant 0 : index
    %3 = vector.load %arg3[%c0_3, %c0_4] : memref<1x128xf32, #tpu.memory_space<vmem>>, vector<1x128xf32>
    %4 = vector.broadcast %3 : vector<1x128xf32> to vector<8x128xf32>
    %5 = arith.addf %2, %4 : vector<8x128xf32>
    %c0_5 = arith.constant 0 : index
    %c0_6 = arith.constant 0 : index
    %6 = vector.load %arg4[%c0_5, %c0_6] : memref<8x128xf32, #tpu.memory_space<vmem>>, vector<8x128xf32>
    tpu.vector_store %arg4[%c0_5, %c0_6], %5 {strides = array<i32>} : memref<8x128xf32, #tpu.memory_space<vmem>>, vector<8x128xf32>,
    return
  }
  func.func @transform_0(%arg0: i32) -> (i32, i32) {
    %c0_i32 = arith.constant 0 : i32
    %c0_i32_0 = arith.constant 0 : i32
    return %arg0, %c0_i32 : i32, i32
  }
  func.func @transform_1(%arg0: i32) -> (i32, i32) {
    %c0_i32 = arith.constant 0 : i32
    %c0_i32_0 = arith.constant 0 : i32
    %c0_i32_1 = arith.constant 0 : i32
    return %c0_i32, %c0_i32_0 : i32, i32
  }
  func.func @transform_2(%arg0: i32) -> (i32, i32) {
    %c0_i32 = arith.constant 0 : i32
    %c0_i32_0 = arith.constant 0 : i32
    %c0_i32_1 = arith.constant 0 : i32
    return %c0_i32, %c0_i32_0 : i32, i32
  }
  func.func @transform_3(%arg0: i32) -> (i32, i32) {
    %c0_i32 = arith.constant 0 : i32
    %c0_i32_0 = arith.constant 0 : i32
    return %arg0, %c0_i32 : i32, i32
  }
}

</mosaic_0001>

<bundles_post_ra>
// kernel: tpu_custom_call.1
= control target key start
LH: loop header
LB: loop body
LE: loop exit
PB: predicated region body
PF: predicated region fallthrough
CT: control target
= control target key end

     0   :  { %8 = vsyncpa [#allocation3], 0  ;;  %s226_s0 = inlined_call_operand.hbm [shape: f32[8,128], index: 0, kind: input, shape index: {}]   ;;  %s227_s1 = inlined_call_operand.hbm [shape: f32[128,128], index: 1, kind: input, shape index: {}]   ;;  %s228_s2 = inlined_call_operand.vmem [shape: f32[1,128], index: 2, kind: input, shape index: {}]   ;;  %s229_s3 = inlined_call_operand.hbm [shape: f32[8,128], index: 3, kind: output, shape index: {}]  }
   0x1   :  { %9 = vsyncpa [#allocation6], 0 }
   0x2   :  { %10 = vsyncpa [#allocation4], 0  ;;  %s16_s14 = sshll.u32 %s226_s0, 4  ;;  %s189_s15 = smov [#allocation2]   ;;  %s17_s14 = int_to_ptr.hbm [resolvable:$true] %s16_s14 }
   0x3   :  { %s18_s16 = sshll.u32 %s189_s15, 4  ;;  %s26_s19 = sshll.u32 %s227_s1, 4  ;;  %s19_s16 = int_to_ptr.vmem [resolvable:$true] %s18_s16  ;;  %s27_s19 = int_to_ptr.hbm [resolvable:$true] %s26_s19 }
   0x4   :  { %21 = dma.hbm_to_vmem [thread:$0]  %s17_s14, 128, %s19_s16, [#allocation3]  }
   0x5   :  { %s190_s20 = smov [#allocation5]   ;;  %s191_s22 = smov 128  }
   0x6   :  { %s28_s21 = sshll.u32 %s190_s20, 4  ;;  %s192_s23 = smov 8   ;;  %s29_s21 = int_to_ptr.vmem [resolvable:$true] %s28_s21 }
   0x7   :  { %34 = dma.hbm_to_vmem [thread:$0]  %s27_s19, 2048, %s29_s21, [#allocation6], %s191_s22, %s191_s22, %s192_s23  }
   0x8   :  { %183 = dma.done.wait [#allocation3], 128  }
   0x9   :  { %184 = vsyncadd [#allocation3], 4294967168 }
   0xa   :  { %185 = dma.done.wait [#allocation6], 2048  }
   0xb   :  { %186 = vsyncadd [#allocation6], 4294965248  ;;  %v61_v0 = vld [vmem:[#allocation5 + $0x78] sm:$0xff]  ;;  %v60_v1 = vld [vmem:[#allocation5 + $0x70] sm:$0xff]  ;;  %s193_s24 = smov [#allocation7]   ;;  %s94_s28 = sshll.u32 %s229_s3, 4  ;;  %s95_s28 = int_to_ptr.hbm [resolvable:$true] %s94_s28 }
   0xc   :  { %66 = vmatpush.msra.mxu0 %v61_v0  ;;  %v59_v2 = vld [vmem:[#allocation5 + $0x68] sm:$0xff]  ;;  %v58_v3 = vld [vmem:[#allocation5 + $0x60] sm:$0xff]  ;;  %v57_v4 = vld [vmem:[#allocation5 + $0x58] sm:$0xff]  ;;  %s92_s25 = sshll.u32 %s193_s24, 4  ;;  %s93_s25 = int_to_ptr.vmem [resolvable:$true] %s92_s25 }
   0xd   :  { %v56_v5 = vld [vmem:[#allocation5 + $0x50] sm:$0xff]  ;;  %v55_v6 = vld [vmem:[#allocation5 + $0x48] sm:$0xff]  ;;  %v54_v7 = vld [vmem:[#allocation5 + $0x40] sm:$0xff] }
   0xe   :  { %67 = vmatpush.msra.mxu0 %v60_v1  ;;  %v53_v8 = vld [vmem:[#allocation5 + $0x38] sm:$0xff]  ;;  %v52_v9 = vld [vmem:[#allocation5 + $0x30] sm:$0xff]  ;;  %v51_v10 = vld [vmem:[#allocation5 + $0x28] sm:$0xff] }
   0xf   :  { %v50_v11 = vld [vmem:[#allocation5 + $0x20] sm:$0xff]  ;;  %v49_v12 = vld [vmem:[#allocation5 + $0x18] sm:$0xff]  ;;  %v48_v13 = vld [vmem:[#allocation5 + $0x10] sm:$0xff] }
  0x10   :  { %68 = vmatpush.msra.mxu0 %v59_v2  ;;  %v47_v14 = vld [vmem:[#allocation5 + $0x8] sm:$0xff]  ;;  %v46_v15 = vld [vmem:[#allocation5] sm:$0xff]  ;;  %v45_v16 = vld [vmem:[#allocation2] sm:$0xff] }
  0x11   :  { %v110_v17 = vld [vmem:[%s228_s2] ss:$0 sm:$0xff] }
  0x12   :  { %69 = vmatpush.msra.mxu0 %v58_v3 }
  0x14   :  { %70 = vmatpush.msra.mxu0 %v57_v4 }
  0x16   :  { %71 = vmatpush.msra.mxu0 %v56_v5 }
  0x18   :  { %72 = vmatpush.msra.mxu0 %v55_v6 }
  0x1a   :  { %73 = vmatpush.msra.mxu0 %v54_v7 }
  0x1c   :  { %74 = vmatpush.msra.mxu0 %v53_v8 }
  0x1e   :  { %75 = vmatpush.msra.mxu0 %v52_v9 }
  0x20   :  { %76 = vmatpush.msra.mxu0 %v51_v10 }
  0x22   :  { %77 = vmatpush.msra.mxu0 %v50_v11 }
  0x24   :  { %78 = vmatpush.msra.mxu0 %v49_v12 }
  0x26   :  { %79 = vmatpush.msra.mxu0 %v48_v13 }
  0x28   :  { %80 = vmatpush.msra.mxu0 %v47_v14 }
  0x2a   :  { %81 = vmatpush.msra.mxu0 %v46_v15 }
  0x2b   :  { %82 = vmatmul.f32.vlgmr.msra.gmra.mxu0 %v45_v16 }
  0xa8   :  { %v83_v18 = vpop.f32.mrf.mxu0 }
  0xa9   :  { %v84_v19 = vadd.f32 %v110_v17, %v83_v18 }
  0xab   :  { %86 = vst [vmem:[#allocation7] sm:$0xff] %v84_v19 }
  0xac   :  { %97 = dma.vmem_to_hbm [thread:$0]  %s93_s25, 128, %s95_s28, [#allocation4]  }
  0xad   :  { %187 = dma.done.wait [#allocation4], 128  }
  0xae   :  { %188 = vsyncadd [#allocation4], 4294967168 }
  0xaf   :  { %102 = vsyncpa [#allocation3], 1 }
  0xb0   :  { %103 = vsyncpa [#allocation6], 1 }
  0xb1   :  { %104 = vsyncpa [#allocation4], 1 }

</bundles_post_ra>
